<compile_context>
chip_gen: v7x
topology: tpu7x:2x2x1
jax: 0.10.0
libtpu: 0.0.40
codegen_flags: <defaults>
</compile_context>

<pallas_src>
import math

import jax
import jax.numpy as jnp
from jax.experimental import pallas as pl
from jax.experimental.pallas import tpu as pltpu


# ----------------------------------------------------------------------------
# Pallas kernel: fused ConditionalLayerNorm over a tile of rows.
# ----------------------------------------------------------------------------
def _make_cln_kernel(D, eps):
    inv_nm1 = 1.0 / max(D - 1, 1)  # torch.std default: unbiased (N-1) estimator

    def kernel(x_ref, mem_ref, gamma_ref, beta_ref,
               w1g_ref, b1g_ref, w2g_ref, b2g_ref,
               w1b_ref, b1b_ref, w2b_ref, b2b_ref, out_ref):
        x = x_ref[...].astype(jnp.float32)        # (R, D)   layernorm math in f32
        mem = mem_ref[...]                        # (R, S*Dm) bf16 MXU operand

        # mlp_gamma: two dots, bf16 inputs, f32 accumulation, f32 bias/ReLU.
        hg = jnp.dot(mem, w1g_ref[...],
                     preferred_element_type=jnp.float32) + b1g_ref[...]
        hg = jnp.maximum(hg, 0.0).astype(w2g_ref.dtype)
        dg = jnp.dot(hg, w2g_ref[...],
                     preferred_element_type=jnp.float32) + b2g_ref[...]

        # mlp_beta.
        hb = jnp.dot(mem, w1b_ref[...],
                     preferred_element_type=jnp.float32) + b1b_ref[...]
        hb = jnp.maximum(hb, 0.0).astype(w2b_ref.dtype)
        db = jnp.dot(hb, w2b_ref[...],
                     preferred_element_type=jnp.float32) + b2b_ref[...]

        gamma_hat = gamma_ref[...] + dg           # (R, D)  no lane-dim slices
        beta_hat = beta_ref[...] + db

        # torch: x.mean(-1), x.std(-1) (unbiased), then / (std + eps)
        mean = jnp.mean(x, axis=-1, keepdims=True)
        centered = x - mean
        var = jnp.sum(centered * centered, axis=-1, keepdims=True) * inv_nm1
        inv_std = pl.reciprocal(jnp.sqrt(var) + eps, approx=True)   # EUP slot
        out_ref[...] = (gamma_hat * centered * inv_std + beta_hat).astype(out_ref.dtype)

    return kernel


# ----------------------------------------------------------------------------
# Row-tile selection: largest tile within a VMEM budget, >= 2 grid steps when
# possible (v7x megacore), always a multiple of 8 sublanes.
# ----------------------------------------------------------------------------
def _round_up(n, m):
    return ((n + m - 1) // m) * m


def _choose_row_block(N, D, Dm_in, io_itemsize, weight_bytes,
                      budget_bytes=40 * 1024 * 1024):
    # Double-buffered pipelined operands per row: x + memory(bf16) + out.
    per_row = 2 * (D * io_itemsize + Dm_in * 2 + D * io_itemsize)
    rb = 8
    for cand in (1024, 512, 256, 128, 64, 32, 16, 8):
        if 2 * weight_bytes + cand * per_row <= budget_bytes:
            rb = cand
            break
    rb = min(rb, _round_up(N, 8))                 # don't exceed the problem
    if N > 8:                                     # >= 2 grid steps for v7x's 2 TCs
        rb = min(rb, _round_up(-(-N // 2), 8))
    return max(rb, 8)


# ----------------------------------------------------------------------------
# pallas_call wrapper for the conditional layernorm
# ----------------------------------------------------------------------------
def conditional_layernorm(x2d, mem2d, prep, eps):
    N, D = x2d.shape
    Dm_in = mem2d.shape[1]
    (gamma, beta, w1g, b1g, w2g, b2g, w1b, b1b, w2b, b2b) = prep

    weight_bytes = sum(int(a.size) * a.dtype.itemsize for a in prep)
    row_block = _choose_row_block(N, D, Dm_in, x2d.dtype.itemsize, weight_bytes)

    padded = _round_up(N, row_block)
    if padded != N:                               # masked tail via zero padding
        x2d = jnp.pad(x2d, ((0, padded - N), (0, 0)))
        mem2d = jnp.pad(mem2d, ((0, padded - N), (0, 0)))
    grid = (padded // row_block,)

    rows = lambda i: (i, 0)
    const = lambda i: (0, 0)

    # NOTE: for very large (Dm_in x D) weights one would additionally
    #   (a) single-buffer the constant-index weight operands
    #       (pipeline_mode=pl.Buffered(1)), and/or
    #   (b) add an innermost "arbitrary" K grid axis tiling the layer-1
    #       contraction with an f32 accumulator scratch;
    # both are unnecessary at these weight sizes so they are omitted here.
    # NOTE: for D < 128 the output is lane-sparse (masked stores); packing
    # multiple rows per 128-lane vreg is possible but not worth the extra
    # segmented-reduction complexity at these shapes.
    out = pl.pallas_call(
        _make_cln_kernel(D, eps),
        out_shape=jax.ShapeDtypeStruct((padded, D), x2d.dtype),
        grid=grid,
        in_specs=[
            pl.BlockSpec((row_block, D), rows),        # x rows          (f32)
            pl.BlockSpec((row_block, Dm_in), rows),    # memory rows     (bf16)
            pl.BlockSpec((1, D), const),               # gamma           (f32)
            pl.BlockSpec((1, D), const),               # beta            (f32)
            pl.BlockSpec((Dm_in, D), const),           # mlp_gamma W1    (bf16)
            pl.BlockSpec((1, D), const),               # mlp_gamma b1    (f32)
            pl.BlockSpec((D, D), const),               # mlp_gamma W2    (bf16)
            pl.BlockSpec((1, D), const),               # mlp_gamma b2    (f32)
            pl.BlockSpec((Dm_in, D), const),           # mlp_beta  W1    (bf16)
            pl.BlockSpec((1, D), const),               # mlp_beta  b1    (f32)
            pl.BlockSpec((D, D), const),               # mlp_beta  W2    (bf16)
            pl.BlockSpec((1, D), const),               # mlp_beta  b2    (f32)
        ],
        out_specs=pl.BlockSpec((row_block, D), rows),
        compiler_params=pltpu.CompilerParams(
            dimension_semantics=("parallel",),         # independent rows
            vmem_limit_bytes=64 * 1024 * 1024),
    )(x2d, mem2d, gamma, beta, w1g, b1g, w2g, b2g, w1b, b1b, w2b, b2b)

    return out[:N] if padded != N else out


# ----------------------------------------------------------------------------
# One-time parameter preparation (runs at init, NOT per forward call)
# ----------------------------------------------------------------------------
def prepare_params(p, matmul_dtype=jnp.bfloat16):
    as_row = lambda v: v.reshape(1, -1).astype(jnp.float32)
    return (as_row(p["gamma"]), as_row(p["beta"]),
            p["w1_g"].astype(matmul_dtype), as_row(p["b1_g"]),
            p["w2_g"].astype(matmul_dtype), as_row(p["b2_g"]),
            p["w1_b"].astype(matmul_dtype), as_row(p["b1_b"]),
            p["w2_b"].astype(matmul_dtype), as_row(p["b2_b"]))


# ----------------------------------------------------------------------------
# ConditionalSublayerConnection.forward(x, sublayer, memory)
# ----------------------------------------------------------------------------
def conditional_sublayer_connection(x, memory, prep, sublayer_fn, eps=1e-6,
                                    mem_matmul_dtype=jnp.bfloat16):
    B, T, D = x.shape
    normed = conditional_layernorm(
        x.reshape(B * T, D),
        memory.reshape(B * T, -1).astype(mem_matmul_dtype),  # halves mem DMA bytes
        prep, eps).reshape(B, T, D)
    # TODO(synk): nn.Dropout omitted (eval-mode forward -> identity).
    # `sublayer` is an arbitrary callable argument of forward(); applied here
    # as a plain JAX function, outside the kernel.
    return x + sublayer_fn(normed.astype(x.dtype))


# ----------------------------------------------------------------------------
# Deterministic parameter init (mirrors the torch module's init scheme)
# ----------------------------------------------------------------------------
def init_params(key, d_model, rm_num_slots, rm_d_model):
    # NOTE: mlp_gamma's second Linear is Linear(rm_d_model, rm_d_model); the
    # torch module only composes when d_model == rm_d_model.
    assert d_model == rm_d_model
    D = d_model
    keys = iter(jax.random.split(key, 8))

    def lin(in_d, out_d):
        bound = math.sqrt(6.0 / (in_d + out_d))              # xavier_uniform_
        w = jax.random.uniform(next(keys), (in_d, out_d), jnp.float32, -bound, bound)
        b = jnp.full((out_d,), 0.1, jnp.float32)             # constant_(bias, 0.1)
        return w, b

    p = {"gamma": jnp.ones((D,), jnp.float32),
         "beta": jnp.zeros((D,), jnp.float32)}
    p["w1_g"], p["b1_g"] = lin(rm_num_slots * rm_d_model, D)
    p["w2_g"], p["b2_g"] = lin(rm_d_model, rm_d_model)
    p["w1_b"], p["b1_b"] = lin(rm_num_slots * rm_d_model, D)
    p["w2_b"], p["b2_b"] = lin(d_model, d_model)
    return p


# ----------------------------------------------------------------------------
# Pure-JAX reference (mirrors the torch code op-for-op, f32) for validation
# ----------------------------------------------------------------------------
def reference_forward(x, memory, p, sublayer_fn, eps=1e-6):
    dg = jax.nn.relu(memory @ p["w1_g"] + p["b1_g"]) @ p["w2_g"] + p["b2_g"]
    db = jax.nn.relu(memory @ p["w1_b"] + p["b1_b"]) @ p["w2_b"] + p["b2_b"]
    mean = jnp.mean(x, axis=-1, keepdims=True)
    std = jnp.std(x, axis=-1, keepdims=True, ddof=1)          # torch.std: unbiased
    normed = (p["gamma"] + dg) * (x - mean) / (std + eps) + (p["beta"] + db)
    return x + sublayer_fn(normed)                            # dropout = identity (eval)


if __name__ == "__main__":
    B, T, d_model, rm_num_slots, rm_d_model = 2, 8, 32, 4, 32
    key = jax.random.PRNGKey(0)
    kp, kx, km, ks = jax.random.split(key, 4)

    params = init_params(kp, d_model, rm_num_slots, rm_d_model)
    x = jax.random.normal(kx, (B, T, d_model), jnp.float32)
    memory = jax.random.normal(km, (B, T, rm_num_slots * rm_d_model), jnp.float32) * 0.5

    # Representative `sublayer` for the demo (forward() takes it as an argument;
    # it is not part of this module) — a simple feed-forward in plain JAX.
    w_sub = jax.random.normal(ks, (d_model, d_model), jnp.float32) / math.sqrt(d_model)
    sublayer_fn = lambda y: jnp.tanh(y @ w_sub)

    prep = prepare_params(params)        # hoisted: runs once at init time
    out = conditional_sublayer_connection(x, memory, prep, sublayer_fn)
    out = jax.block_until_ready(out)

    ref = reference_forward(x, memory, params, sublayer_fn)
    err = float(jnp.max(jnp.abs(out - ref)))
    assert out.shape == (B, T, d_model), out.shape
    # Tolerance covers bf16 MXU operands + approx-EUP reciprocal vs f32 reference.
    assert err < 5e-2, f"max abs diff vs reference: {err}"
    print("KERNEL_OK")
</pallas_src>

<mosaic_0001>
module attributes {stable_mosaic.version = 11 : i64} {
  func.func @kernel(%arg0: i32, %arg1: memref<8x32xf32, #tpu.memory_space<vmem>>, %arg2: memref<8x128xbf16, #tpu.memory_space<vmem>>, %arg3: memref<1x32xf32, #tpu.memory_space<vmem>>, %arg4: memref<1x32xf32, #tpu.memory_space<vmem>>, %arg5: memref<128x32xbf16, #tpu.memory_space<vmem>>, %arg6: memref<1x32xf32, #tpu.memory_space<vmem>>, %arg7: memref<32x32xbf16, #tpu.memory_space<vmem>>, %arg8: memref<1x32xf32, #tpu.memory_space<vmem>>, %arg9: memref<128x32xbf16, #tpu.memory_space<vmem>>, %arg10: memref<1x32xf32, #tpu.memory_space<vmem>>, %arg11: memref<32x32xbf16, #tpu.memory_space<vmem>>, %arg12: memref<1x32xf32, #tpu.memory_space<vmem>>, %arg13: memref<8x32xf32, #tpu.memory_space<vmem>>) attributes {dimension_semantics = [#tpu.dimension_semantics<parallel>], iteration_bounds = array<i64: 2>, scalar_prefetch = 0 : i64, scratch_operands = 0 : i64, tpu.core_type = #tpu.core_type<tc>, window_params = [{transform_indices = @transform_0, window_bounds = array<i64: 8, 32>}, {transform_indices = @transform_1, window_bounds = array<i64: 8, 128>}, {pipeline_mode = #tpu.pipeline_mode<synchronous>, transform_indices = @transform_2, window_bounds = array<i64: 1, 32>}, {pipeline_mode = #tpu.pipeline_mode<synchronous>, transform_indices = @transform_3, window_bounds = array<i64: 1, 32>}, {pipeline_mode = #tpu.pipeline_mode<synchronous>, transform_indices = @transform_4, window_bounds = array<i64: 128, 32>}, {pipeline_mode = #tpu.pipeline_mode<synchronous>, transform_indices = @transform_5, window_bounds = array<i64: 1, 32>}, {pipeline_mode = #tpu.pipeline_mode<synchronous>, transform_indices = @transform_6, window_bounds = array<i64: 32, 32>}, {pipeline_mode = #tpu.pipeline_mode<synchronous>, transform_indices = @transform_7, window_bounds = array<i64: 1, 32>}, {pipeline_mode = #tpu.pipeline_mode<synchronous>, transform_indices = @transform_8, window_bounds = array<i64: 128, 32>}, {pipeline_mode = #tpu.pipeline_mode<synchronous>, transform_indices = @transform_9, window_bounds = array<i64: 1, 32>}, {pipeline_mode = #tpu.pipeline_mode<synchronous>, transform_indices = @transform_10, window_bounds = array<i64: 32, 32>}, {pipeline_mode = #tpu.pipeline_mode<synchronous>, transform_indices = @transform_11, window_bounds = array<i64: 1, 32>}, {transform_indices = @transform_12, window_bounds = array<i64: 8, 32>}]} {
    %c0 = arith.constant 0 : index
    %c0_0 = arith.constant 0 : index
    %0 = vector.load %arg1[%c0, %c0_0] : memref<8x32xf32, #tpu.memory_space<vmem>>, vector<8x32xf32>
    %c0_1 = arith.constant 0 : index
    %c0_2 = arith.constant 0 : index
    %1 = vector.load %arg2[%c0_1, %c0_2] : memref<8x128xbf16, #tpu.memory_space<vmem>>, vector<8x128xbf16>
    %c0_3 = arith.constant 0 : index
    %c0_4 = arith.constant 0 : index
    %2 = vector.load %arg5[%c0_3, %c0_4] : memref<128x32xbf16, #tpu.memory_space<vmem>>, vector<128x32xbf16>
    %cst = arith.constant dense<0.000000e+00> : vector<8x32xf32>
    %3 = tpu.matmul %1, %2, %cst {dimension_numbers = #tpu.dot_dimension_numbers<[1], [0], [0], [1], [0, 0, 1, 1], [], []>} : vector<8x128xbf16>, vector<128x32xbf16>, vector<8x32xf32> -> vector<8x32xf32>
    %c0_5 = arith.constant 0 : index
    %c0_6 = arith.constant 0 : index
    %4 = vector.load %arg6[%c0_5, %c0_6] : memref<1x32xf32, #tpu.memory_space<vmem>>, vector<1x32xf32>
    %5 = vector.broadcast %4 : vector<1x32xf32> to vector<8x32xf32>
    %6 = arith.addf %3, %5 : vector<8x32xf32>
    %cst_7 = arith.constant 0.000000e+00 : f32
    %7 = vector.broadcast %cst_7 : f32 to vector<8x32xf32>
    %8 = arith.maximumf %6, %7 : vector<8x32xf32>
    %9 = arith.truncf %8 : vector<8x32xf32> to vector<8x32xbf16>
    %c0_8 = arith.constant 0 : index
    %c0_9 = arith.constant 0 : index
    %10 = vector.load %arg7[%c0_8, %c0_9] : memref<32x32xbf16, #tpu.memory_space<vmem>>, vector<32x32xbf16>
    %cst_10 = arith.constant dense<0.000000e+00> : vector<8x32xf32>
    %11 = tpu.matmul %9, %10, %cst_10 {dimension_numbers = #tpu.dot_dimension_numbers<[1], [0], [0], [1], [0, 0, 1, 1], [], []>} : vector<8x32xbf16>, vector<32x32xbf16>, vector<8x32xf32> -> vector<8x32xf32>
    %c0_11 = arith.constant 0 : index
    %c0_12 = arith.constant 0 : index
    %12 = vector.load %arg8[%c0_11, %c0_12] : memref<1x32xf32, #tpu.memory_space<vmem>>, vector<1x32xf32>
    %13 = vector.broadcast %12 : vector<1x32xf32> to vector<8x32xf32>
    %14 = arith.addf %11, %13 : vector<8x32xf32>
    %c0_13 = arith.constant 0 : index
    %c0_14 = arith.constant 0 : index
    %15 = vector.load %arg9[%c0_13, %c0_14] : memref<128x32xbf16, #tpu.memory_space<vmem>>, vector<128x32xbf16>
    %cst_15 = arith.constant dense<0.000000e+00> : vector<8x32xf32>
    %16 = tpu.matmul %1, %15, %cst_15 {dimension_numbers = #tpu.dot_dimension_numbers<[1], [0], [0], [1], [0, 0, 1, 1], [], []>} : vector<8x128xbf16>, vector<128x32xbf16>, vector<8x32xf32> -> vector<8x32xf32>
    %c0_16 = arith.constant 0 : index
    %c0_17 = arith.constant 0 : index
    %17 = vector.load %arg10[%c0_16, %c0_17] : memref<1x32xf32, #tpu.memory_space<vmem>>, vector<1x32xf32>
    %18 = vector.broadcast %17 : vector<1x32xf32> to vector<8x32xf32>
    %19 = arith.addf %16, %18 : vector<8x32xf32>
    %cst_18 = arith.constant 0.000000e+00 : f32
    %20 = vector.broadcast %cst_18 : f32 to vector<8x32xf32>
    %21 = arith.maximumf %19, %20 : vector<8x32xf32>
    %22 = arith.truncf %21 : vector<8x32xf32> to vector<8x32xbf16>
    %c0_19 = arith.constant 0 : index
    %c0_20 = arith.constant 0 : index
    %23 = vector.load %arg11[%c0_19, %c0_20] : memref<32x32xbf16, #tpu.memory_space<vmem>>, vector<32x32xbf16>
    %cst_21 = arith.constant dense<0.000000e+00> : vector<8x32xf32>
    %24 = tpu.matmul %22, %23, %cst_21 {dimension_numbers = #tpu.dot_dimension_numbers<[1], [0], [0], [1], [0, 0, 1, 1], [], []>} : vector<8x32xbf16>, vector<32x32xbf16>, vector<8x32xf32> -> vector<8x32xf32>
    %c0_22 = arith.constant 0 : index
    %c0_23 = arith.constant 0 : index
    %25 = vector.load %arg12[%c0_22, %c0_23] : memref<1x32xf32, #tpu.memory_space<vmem>>, vector<1x32xf32>
    %26 = vector.broadcast %25 : vector<1x32xf32> to vector<8x32xf32>
    %27 = arith.addf %24, %26 : vector<8x32xf32>
    %c0_24 = arith.constant 0 : index
    %c0_25 = arith.constant 0 : index
    %28 = vector.load %arg3[%c0_24, %c0_25] : memref<1x32xf32, #tpu.memory_space<vmem>>, vector<1x32xf32>
    %29 = vector.broadcast %28 : vector<1x32xf32> to vector<8x32xf32>
    %30 = arith.addf %29, %14 : vector<8x32xf32>
    %c0_26 = arith.constant 0 : index
    %c0_27 = arith.constant 0 : index
    %31 = vector.load %arg4[%c0_26, %c0_27] : memref<1x32xf32, #tpu.memory_space<vmem>>, vector<1x32xf32>
    %32 = vector.broadcast %31 : vector<1x32xf32> to vector<8x32xf32>
    %33 = arith.addf %32, %27 : vector<8x32xf32>
    %cst_28 = arith.constant dense<0.000000e+00> : vector<8xf32>
    %34 = vector.multi_reduction <add>, %0, %cst_28 [1] : vector<8x32xf32> to vector<8xf32>
    %35 = vector.shape_cast %34 : vector<8xf32> to vector<8x1xf32>
    %cst_29 = arith.constant 3.200000e+01 : f32
    %36 = vector.broadcast %cst_29 : f32 to vector<8x1xf32>
    %37 = arith.divf %35, %36 : vector<8x1xf32>
    %38 = vector.broadcast %37 : vector<8x1xf32> to vector<8x32xf32>
    %39 = arith.subf %0, %38 : vector<8x32xf32>
    %40 = arith.mulf %39, %39 : vector<8x32xf32>
    %cst_30 = arith.constant dense<0.000000e+00> : vector<8xf32>
    %41 = vector.multi_reduction <add>, %40, %cst_30 [1] : vector<8x32xf32> to vector<8xf32>
    %42 = vector.shape_cast %41 : vector<8xf32> to vector<8x1xf32>
    %cst_31 = arith.constant 0.0322580636 : f32
    %43 = vector.broadcast %cst_31 : f32 to vector<8x1xf32>
    %44 = arith.mulf %42, %43 : vector<8x1xf32>
    %45 = math.sqrt %44 : vector<8x1xf32>
    %cst_32 = arith.constant 9.99999997E-7 : f32
    %46 = vector.broadcast %cst_32 : f32 to vector<8x1xf32>
    %47 = arith.addf %45, %46 : vector<8x1xf32>
    %48 = tpu.reciprocal %47 {approx = true} : vector<8x1xf32> -> vector<8x1xf32>
    %49 = arith.mulf %30, %39 : vector<8x32xf32>
    %50 = vector.broadcast %48 : vector<8x1xf32> to vector<8x32xf32>
    %51 = arith.mulf %49, %50 : vector<8x32xf32>
    %52 = arith.addf %51, %33 : vector<8x32xf32>
    %c0_33 = arith.constant 0 : index
    %c0_34 = arith.constant 0 : index
    %53 = vector.load %arg13[%c0_33, %c0_34] : memref<8x32xf32, #tpu.memory_space<vmem>>, vector<8x32xf32>
    tpu.vector_store %arg13[%c0_33, %c0_34], %52 {strides = array<i32>} : memref<8x32xf32, #tpu.memory_space<vmem>>, vector<8x32xf32>,
    return
  }
  func.func @transform_0(%arg0: i32) -> (i32, i32) {
    %c0_i32 = arith.constant 0 : i32
    %c0_i32_0 = arith.constant 0 : i32
    return %arg0, %c0_i32 : i32, i32
  }
  func.func @transform_1(%arg0: i32) -> (i32, i32) {
    %c0_i32 = arith.constant 0 : i32
    %c0_i32_0 = arith.constant 0 : i32
    return %arg0, %c0_i32 : i32, i32
  }
  func.func @transform_2(%arg0: i32) -> (i32, i32) {
    %c0_i32 = arith.constant 0 : i32
    %c0_i32_0 = arith.constant 0 : i32
    %c0_i32_1 = arith.constant 0 : i32
    return %c0_i32, %c0_i32_0 : i32, i32
  }
  func.func @transform_3(%arg0: i32) -> (i32, i32) {
    %c0_i32 = arith.constant 0 : i32
    %c0_i32_0 = arith.constant 0 : i32
    %c0_i32_1 = arith.constant 0 : i32
    return %c0_i32, %c0_i32_0 : i32, i32
  }
  func.func @transform_4(%arg0: i32) -> (i32, i32) {
    %c0_i32 = arith.constant 0 : i32
    %c0_i32_0 = arith.constant 0 : i32
    %c0_i32_1 = arith.constant 0 : i32
    return %c0_i32, %c0_i32_0 : i32, i32
  }
  func.func @transform_5(%arg0: i32) -> (i32, i32) {
    %c0_i32 = arith.constant 0 : i32
    %c0_i32_0 = arith.constant 0 : i32
    %c0_i32_1 = arith.constant 0 : i32
    return %c0_i32, %c0_i32_0 : i32, i32
  }
  func.func @transform_6(%arg0: i32) -> (i32, i32) {
    %c0_i32 = arith.constant 0 : i32
    %c0_i32_0 = arith.constant 0 : i32
    %c0_i32_1 = arith.constant 0 : i32
    return %c0_i32, %c0_i32_0 : i32, i32
  }
  func.func @transform_7(%arg0: i32) -> (i32, i32) {
    %c0_i32 = arith.constant 0 : i32
    %c0_i32_0 = arith.constant 0 : i32
    %c0_i32_1 = arith.constant 0 : i32
    return %c0_i32, %c0_i32_0 : i32, i32
  }
  func.func @transform_8(%arg0: i32) -> (i32, i32) {
    %c0_i32 = arith.constant 0 : i32
    %c0_i32_0 = arith.constant 0 : i32
    %c0_i32_1 = arith.constant 0 : i32
    return %c0_i32, %c0_i32_0 : i32, i32
  }
  func.func @transform_9(%arg0: i32) -> (i32, i32) {
    %c0_i32 = arith.constant 0 : i32
    %c0_i32_0 = arith.constant 0 : i32
    %c0_i32_1 = arith.constant 0 : i32
    return %c0_i32, %c0_i32_0 : i32, i32
  }
  func.func @transform_10(%arg0: i32) -> (i32, i32) {
    %c0_i32 = arith.constant 0 : i32
    %c0_i32_0 = arith.constant 0 : i32
    %c0_i32_1 = arith.constant 0 : i32
    return %c0_i32, %c0_i32_0 : i32, i32
  }
  func.func @transform_11(%arg0: i32) -> (i32, i32) {
    %c0_i32 = arith.constant 0 : i32
    %c0_i32_0 = arith.constant 0 : i32
    %c0_i32_1 = arith.constant 0 : i32
    return %c0_i32, %c0_i32_0 : i32, i32
  }
  func.func @transform_12(%arg0: i32) -> (i32, i32) {
    %c0_i32 = arith.constant 0 : i32
    %c0_i32_0 = arith.constant 0 : i32
    return %arg0, %c0_i32 : i32, i32
  }
}

</mosaic_0001>

<bundles_post_ra>
// kernel: tpu_custom_call.1
= control target key start
LH: loop header
LB: loop body
LE: loop exit
PB: predicated region body
PF: predicated region fallthrough
CT: control target
= control target key end

     0   :  { %s2570_s0 = inlined_call_operand.hbm [shape: f32[16,32], index: 0, kind: input, shape index: {}]   ;;  %s2571_s1 = inlined_call_operand.hbm [shape: bf16[16,128], index: 1, kind: input, shape index: {}]   ;;  %s2572_s2 = inlined_call_operand.hbm [shape: f32[1,32], index: 2, kind: input, shape index: {}]   ;;  %s2573_s3 = inlined_call_operand.hbm [shape: f32[1,32], index: 3, kind: input, shape index: {}]   ;;  %s2574_s4 = inlined_call_operand.hbm [shape: bf16[128,32], index: 4, kind: input, shape index: {}]   ;;  %s2575_s5 = inlined_call_operand.hbm [shape: f32[1,32], index: 5, kind: input, shape index: {}]   ;;  %s2576_s6 = inlined_call_operand.hbm [shape: bf16[32,32], index: 6, kind: input, shape index: {}]   ;;  %s2577_s7 = inlined_call_operand.hbm [shape: f32[1,32], index: 7, kind: input, shape index: {}]   ;;  %s2578_s8 = inlined_call_operand.hbm [shape: bf16[128,32], index: 8, kind: input, shape index: {}]   ;;  %s2579_s9 = inlined_call_operand.hbm [shape: f32[1,32], index: 9, kind: input, shape index: {}]   ;;  %s2580_s10 = inlined_call_operand.hbm [shape: bf16[32,32], index: 10, kind: input, shape index: {}]   ;;  %s2581_s11 = inlined_call_operand.hbm [shape: f32[1,32], index: 11, kind: input, shape index: {}]   ;;  %s2582_s12 = inlined_call_operand.hbm [shape: f32[16,32], index: 12, kind: output, shape index: {}]  }
   0x1   :  { %2590 = sst [smem:[#allocation33_spill]] %s2570_s0 }
   0x2   :  { %2591 = sst [smem:[#allocation34_spill]] %s2571_s1 }
   0x3   :  { %2592 = sst [smem:[#allocation35_spill]] %s2572_s2 }
   0x4   :  { %2593 = sst [smem:[#allocation36_spill]] %s2573_s3 }
   0x5   :  { %2594 = sst [smem:[#allocation37_spill]] %s2574_s4 }
   0x6   :  { %2595 = sst [smem:[#allocation38_spill]] %s2575_s5 }
   0x7   :  { %2596 = sst [smem:[#allocation39_spill]] %s2576_s6 }
   0x8   :  { %2597 = sst [smem:[#allocation40_spill]] %s2582_s12 }
   0x9   :  { %17 = vsyncpa [#allocation3], 0 }
   0xa   :  { %19 = vsyncpa [#allocation3 + $0x1], 0 }
   0xb   :  { %20 = vsyncpa [#allocation6], 0 }
   0xc   :  { %22 = vsyncpa [#allocation6 + $0x1], 0 }
   0xd   :  { %23 = vsyncpa [#allocation9], 0 }
   0xe   :  { %24 = vsyncpa [#allocation12], 0 }
   0xf   :  { %25 = vsyncpa [#allocation15], 0 }
  0x10   :  { %26 = vsyncpa [#allocation18], 0 }
  0x11   :  { %27 = vsyncpa [#allocation21], 0 }
  0x12   :  { %28 = vsyncpa [#allocation4], 0 }
  0x13   :  { %30 = vsyncpa [#allocation4 + $0x1], 0  ;;  %s2044_s21 = smov 0   ;;  %s2046_s22 = smov 0  }
  0x14   :  { %s2048_s23 = smov 0   ;;  %s2050_s24 = smov 0  }
  0x15 LB: > { %s1962_s25 = smov [#allocation7]   ;;  %s2065_s27 = sadd.s32 4294967295, %s1960_s24   ;;  %s1960_s24 = sphi %s2050_s24, %s2639_s24   ;;  %s1956_s23 = sphi %s2048_s23, %s2638_s23   ;;  %s1952_s22 = sphi %s2046_s22, %s2637_s22   ;;  %s1948_s21 = sphi %s2044_s21, %s2636_s21  }
  0x16   : > { %s342_s26 = sshll.u32 %s1962_s25, 4  ;;  %p1204_p0 = scmp.ge.s32.totalorder %s1960_s24, 1  ;;  %s2070_s26 = int_to_ptr.vmem [resolvable:$true] %s342_s26 }
  0x17   : > { %p2586_p1 = scmp.eq.s32.totalorder %s2065_s27, 0  ;;  %p329_p2 = scmp.lt.s32.totalorder %s1960_s24, 3 }
  0x18   : > { %s1963_s29 = smov [#allocation8]   ;;  %s1964_s13 = smov [#allocation11]  }
  0x19   : > { %p2072_p3 = pnand %p1204_p0, %p329_p2  ;;  %s353_s30 = sshll.u32 %s1963_s29, 4  ;;  %s2079_s30 = int_to_ptr.vmem [resolvable:$true] %s353_s30 }
  0x1a   : > { %s377_s14 = sshll.u32 %s1964_s13, 4  ;;  %s1965_s16 = smov [#allocation14]   ;;  %s2087_s14 = int_to_ptr.vmem [resolvable:$true] %s377_s14 }
  0x1b   : > { %s2598_s28 = scalar_select %p2072_p3, 1, 0 }
  0x1c   : > { %p1392_p5 = pneg %p2072_p3  ;;  %s2089_s17 = sshll.u32 %s1965_s16, 4  ;;  %s402_s17 = int_to_ptr.vmem [resolvable:$true] %s2089_s17 }
  0x1d   : > { %2599 = sst [smem:[#allocation32_spill]] %s2598_s28  ;;  %s2601_s2 = sld [smem:[#allocation35_spill]] }
  0x1e   : > { %p2083_p6 = pnand %p1392_p5, %p2586_p1 }
  0x20   : > { %p2099_p8 = pneg %p2083_p6 }
  0x23   : > { %s1526_s20 = scalar_lea.hbm %s2601_s2, 16 }
  0x24   : > { %p1527_p7 = scmp.ne.s32.totalorder %s2601_s2, %s1526_s20  ;;  %p1533_p11 = scmp.lt.u32.totalorder %s1526_s20, %s2601_s2 }
  0x26   : > { %p1529_p9 = pnand %p2099_p8, %p1527_p7 }
  0x28   : > { %p1530_p10 = pneg %p1529_p9 }
  0x2a   : > { %p1535_p12 = pnand %p1533_p11, %p1530_p10 }
  0x2c   : > { %1538 = shalt.err (!%p1535_p12)
}
  0x2d   : > { %s1539_s18 = scalar_lea.vmem %s2070_s26, 16  ;;  %s1546_s19 = scalar_lea.vmem %s2070_s26, 32 }
  0x2e   : > { %p1540_p13 = scmp.ne.s32.totalorder %s2070_s26, %s1539_s18  ;;  %p1547_p5 = scmp.lt.s32.totalorder %s2070_s26, %s2070_s26 }
  0x2f   : > { %p1548_p7 = scmp.lt.s32.totalorder %s1546_s19, %s1539_s18 }
  0x30   : > { %p1542_p0 = pnand %p1540_p13, %p2099_p8 }
  0x31   : > { %p1549_p9 = por %p1548_p7, %p1547_p5 }
  0x32   : > { %p1543_p2 = pneg %p1542_p0 }
  0x34   : > { %p1550_p4 = pnand %p1549_p9, %p1543_p2 }
  0x36   : > { %1553 = shalt.err (!%p1550_p4)
}
  0x37   : > { %1395 = dma.hbm_to_vmem [thread:$0]  (!%p2083_p6), %s2601_s2, 16, %s2070_s26, [#allocation6]  }
  0x38   : > { %s2603_s3 = sld [smem:[#allocation36_spill]] }
  0x3e   : > { %s1554_s16 = scalar_lea.hbm %s2603_s3, 16 }
  0x3f   : > { %p1555_p10 = scmp.ne.s32.totalorder %s2603_s3, %s1554_s16  ;;  %p1561_p4 = scmp.lt.u32.totalorder %s1554_s16, %s2603_s3 }
  0x41   : > { %p1557_p11 = pnand %p1555_p10, %p2099_p8 }
  0x43   : > { %p1558_p12 = pneg %p1557_p11 }
  0x45   : > { %p1563_p13 = pnand %p1561_p4, %p1558_p12 }
  0x47   : > { %1566 = shalt.err (!%p1563_p13)
}
  0x48   : > { %s1567_s26 = scalar_lea.vmem %s2079_s30, 16  ;;  %s1574_s1 = scalar_lea.vmem %s2079_s30, 32 }
  0x49   : > { %p1568_p0 = scmp.ne.s32.totalorder %s2079_s30, %s1567_s26  ;;  %p1575_p7 = scmp.lt.s32.totalorder %s2079_s30, %s2079_s30 }
  0x4a   : > { %p1576_p9 = scmp.lt.s32.totalorder %s1574_s1, %s1567_s26 }
  0x4b   : > { %p1570_p2 = pnand %p1568_p0, %p2099_p8 }
  0x4c   : > { %p1577_p10 = por %p1576_p9, %p1575_p7 }
  0x4d   : > { %p1571_p5 = pneg %p1570_p2 }
  0x4f   : > { %p1578_p11 = pnand %p1577_p10, %p1571_p5 }
  0x51   : > { %1581 = shalt.err (!%p1578_p11)
}
  0x52   : > { %1398 = dma.hbm_to_vmem [thread:$0]  (!%p2083_p6), %s2603_s3, 16, %s2079_s30, [#allocation9]  }
  0x53   : > { %s2604_s5 = sld [smem:[#allocation38_spill]] }
  0x59   : > { %s1582_s29 = scalar_lea.hbm %s2604_s5, 16 }
  0x5a   : > { %p1583_p12 = scmp.ne.s32.totalorder %s2604_s5, %s1582_s29  ;;  %p1589_p0 = scmp.lt.u32.totalorder %s1582_s29, %s2604_s5 }
  0x5c   : > { %p1585_p4 = pnand %p1583_p12, %p2099_p8 }
  0x5e   : > { %p1586_p13 = pneg %p1585_p4 }
  0x60   : > { %p1591_p2 = pnand %p1589_p0, %p1586_p13 }
  0x62   : > { %1594 = shalt.err (!%p1591_p2)
}
  0x63   : > { %s1595_s30 = scalar_lea.vmem %s2087_s14, 16  ;;  %s1602_s1 = scalar_lea.vmem %s2087_s14, 32 }
  0x64   : > { %p1596_p5 = scmp.ne.s32.totalorder %s2087_s14, %s1595_s30  ;;  %p1603_p10 = scmp.lt.s32.totalorder %s2087_s14, %s2087_s14 }
  0x65   : > { %p1604_p11 = scmp.lt.s32.totalorder %s1602_s1, %s1595_s30 }
  0x66   : > { %p1598_p7 = pnand %p1596_p5, %p2099_p8 }
  0x67   : > { %p1605_p12 = por %p1604_p11, %p1603_p10 }
  0x68   : > { %p1599_p9 = pneg %p1598_p7 }
  0x6a   : > { %p1606_p4 = pnand %p1605_p12, %p1599_p9 }
  0x6c   : > { %1609 = shalt.err (!%p1606_p4)
}
  0x6d   : > { %1404 = dma.hbm_to_vmem [thread:$0]  (!%p2083_p6), %s2604_s5, 16, %s2087_s14, [#allocation12]  }
  0x6e   : > { %s1966_s20 = smov [#allocation17]   ;;  %s1610_s18 = scalar_lea.hbm %s2577_s7, 16 }
  0x6f   : > { %s425_s25 = sshll.u32 %s1966_s20, 4  ;;  %p1611_p13 = scmp.ne.s32.totalorder %s2577_s7, %s1610_s18  ;;  %s426_s25 = int_to_ptr.vmem [resolvable:$true] %s425_s25 }
  0x70   : > { %p1617_p5 = scmp.lt.u32.totalorder %s1610_s18, %s2577_s7 }
  0x71   : > { %p1613_p0 = pnand %p1611_p13, %p2099_p8 }
  0x73   : > { %p1614_p2 = pneg %p1613_p0 }
  0x75   : > { %p1619_p7 = pnand %p1617_p5, %p1614_p2 }
  0x77   : > { %1622 = shalt.err (!%p1619_p7)
}
  0x78   : > { %s1623_s14 = scalar_lea.vmem %s402_s17, 16  ;;  %s1630_s28 = scalar_lea.vmem %s402_s17, 32 }
  0x79   : > { %p1624_p9 = scmp.ne.s32.totalorder %s402_s17, %s1623_s14  ;;  %p1631_p12 = scmp.lt.s32.totalorder %s402_s17, %s402_s17 }
  0x7a   : > { %p1632_p4 = scmp.lt.s32.totalorder %s1630_s28, %s1623_s14 }
  0x7b   : > { %p1626_p10 = pnand %p1624_p9, %p2099_p8 }
  0x7c   : > { %p1633_p1 = por %p1632_p4, %p1631_p12 }
  0x7d   : > { %p1627_p11 = pneg %p1626_p10 }
  0x7f   : > { %p1634_p3 = pnand %p1633_p1, %p1627_p11 }
  0x81   : > { %1637 = shalt.err (!%p1634_p3)
}
  0x82   : > { %1410 = dma.hbm_to_vmem [thread:$0]  (!%p2083_p6), %s2577_s7, 16, %s402_s17, [#allocation15]  }
  0x83   : > { %s1638_s18 = scalar_lea.hbm %s2579_s9, 16 }
  0x84   : > { %p1639_p13 = scmp.ne.s32.totalorder %s2579_s9, %s1638_s18  ;;  %p1645_p3 = scmp.lt.u32.totalorder %s1638_s18, %s2579_s9 }
  0x86   : > { %p1641_p0 = pnand %p1639_p13, %p2099_p8 }
  0x88   : > { %p1642_p1 = pneg %p1641_p0 }
  0x8a   : > { %p1647_p2 = pnand %p1645_p3, %p1642_p1 }
  0x8c   : > { %1650 = shalt.err (!%p1647_p2)
}
  0x8d   : > { %s1651_s14 = scalar_lea.vmem %s426_s25, 16  ;;  %s1658_s17 = scalar_lea.vmem %s426_s25, 32 }
  0x8e   : > { %p1652_p5 = scmp.ne.s32.totalorder %s426_s25, %s1651_s14  ;;  %p1659_p10 = scmp.lt.s32.totalorder %s426_s25, %s426_s25 }
  0x8f   : > { %p1660_p11 = scmp.lt.s32.totalorder %s1658_s17, %s1651_s14 }
  0x90   : > { %p1654_p7 = pnand %p1652_p5, %p2099_p8 }
  0x91   : > { %p1661_p12 = por %p1660_p11, %p1659_p10 }
  0x92   : > { %p1655_p9 = pneg %p1654_p7 }
  0x94   : > { %p1662_p4 = pnand %p1661_p12, %p1655_p9 }
  0x96   : > { %1665 = shalt.err (!%p1662_p4)
}
  0x97   : > { %1416 = dma.hbm_to_vmem [thread:$0]  (!%p2083_p6), %s2579_s9, 16, %s426_s25, [#allocation18]  }
  0x98   : > { %s1967_s20 = smov [#allocation10]   ;;  %s2605_s4 = sld [smem:[#allocation37_spill]] }
  0x99   : > { %s363_s29 = sshll.u32 %s1967_s20, 4  ;;  %s364_s29 = int_to_ptr.vmem [resolvable:$true] %s363_s29 }
  0x9e   : > { %s1666_s19 = scalar_lea.hbm %s2605_s4, 1024 }
  0x9f   : > { %p1667_p13 = scmp.ne.s32.totalorder %s2605_s4, %s1666_s19  ;;  %p1673_p3 = scmp.lt.u32.totalorder %s1666_s19, %s2605_s4 }
  0xa1   : > { %p1669_p0 = pnand %p1667_p13, %p2099_p8 }
  0xa3   : > { %p1670_p1 = pneg %p1669_p0 }
  0xa5   : > { %p1675_p2 = pnand %p1673_p3, %p1670_p1 }
  0xa7   : > { %1678 = shalt.err (!%p1675_p2)
}
  0xa8   : > { %s1679_s25 = scalar_lea.vmem %s364_s29, 1024  ;;  %p1687_p10 = scmp.lt.s32.totalorder %s364_s29, %s364_s29 }
  0xa9   : > { %p1680_p5 = scmp.ne.s32.totalorder %s364_s29, %s1679_s25  ;;  %p1688_p11 = scmp.lt.s32.totalorder %s1679_s25, %s1679_s25 }
  0xab   : > { %p1682_p7 = pnand %p1680_p5, %p2099_p8  ;;  %p1689_p12 = por %p1688_p11, %p1687_p10 }
  0xad   : > { %p1683_p9 = pneg %p1682_p7 }
  0xaf   : > { %p1690_p4 = pnand %p1689_p12, %p1683_p9 }
  0xb1   : > { %1693 = shalt.err (!%p1690_p4)
}
  0xb2   : > { %s1968_s17 = smov 64   ;;  %s1969_s28 = smov 4  }
  0xb3   : > { %1401 = dma.hbm_to_vmem [thread:$0]  (!%p2083_p6), %s2605_s4, 1024, %s364_s29, [#allocation9], %s1968_s17, %s1968_s17, %s1969_s28  }
  0xb4   : > { %s1970_s16 = smov [#allocation13]   ;;  %s1971_s19 = smov [#allocation16]  }
  0xb5   : > { %s387_s18 = sshll.u32 %s1970_s16, 4  ;;  %s411_s26 = sshll.u32 %s1971_s19, 4  ;;  %s388_s18 = int_to_ptr.vmem [resolvable:$true] %s387_s18  ;;  %s2227_s26 = int_to_ptr.vmem [resolvable:$true] %s411_s26 }
  0xb6   : > { %s2606_s6 = sld [smem:[#allocation39_spill]] }
  0xbc   : > { %s1694_s14 = scalar_lea.hbm %s2606_s6, 256 }
  0xbd   : > { %p1695_p13 = scmp.ne.s32.totalorder %s2606_s6, %s1694_s14  ;;  %p1701_p3 = scmp.lt.u32.totalorder %s1694_s14, %s2606_s6 }
  0xbf   : > { %p1697_p0 = pnand %p1695_p13, %p2099_p8 }
  0xc1   : > { %p1698_p1 = pneg %p1697_p0 }
  0xc3   : > { %p1703_p2 = pnand %p1701_p3, %p1698_p1 }
  0xc5   : > { %1706 = shalt.err (!%p1703_p2)
}
  0xc6   : > { %s1707_s20 = scalar_lea.vmem %s388_s18, 256  ;;  %p1715_p10 = scmp.lt.s32.totalorder %s388_s18, %s388_s18 }
  0xc7   : > { %p1708_p5 = scmp.ne.s32.totalorder %s388_s18, %s1707_s20  ;;  %p1716_p11 = scmp.lt.s32.totalorder %s1707_s20, %s1707_s20 }
  0xc9   : > { %p1710_p7 = pnand %p1708_p5, %p2099_p8  ;;  %p1717_p12 = por %p1716_p11, %p1715_p10 }
  0xcb   : > { %p1711_p9 = pneg %p1710_p7 }
  0xcd   : > { %p1718_p4 = pnand %p1717_p12, %p1711_p9 }
  0xcf   : > { %1721 = shalt.err (!%p1718_p4)
}
  0xd0   : > { %1407 = dma.hbm_to_vmem [thread:$0]  (!%p2083_p6), %s2606_s6, 256, %s388_s18, [#allocation12], %s1968_s17, %s1968_s17, %s1969_s28  }
  0xd1   : > { %s1722_s1 = scalar_lea.hbm %s2578_s8, 1024 }
  0xd2   : > { %p1723_p13 = scmp.ne.s32.totalorder %s2578_s8, %s1722_s1  ;;  %p1729_p3 = scmp.lt.u32.totalorder %s1722_s1, %s2578_s8 }
  0xd4   : > { %p1725_p0 = pnand %p1723_p13, %p2099_p8 }
  0xd6   : > { %p1726_p1 = pneg %p1725_p0 }
  0xd8   : > { %p1731_p2 = pnand %p1729_p3, %p1726_p1 }
  0xda   : > { %1734 = shalt.err (!%p1731_p2)
}
  0xdb   : > { %s1735_s18 = scalar_lea.vmem %s2227_s26, 1024  ;;  %p1743_p10 = scmp.lt.s32.totalorder %s2227_s26, %s2227_s26 }
  0xdc   : > { %p1736_p5 = scmp.ne.s32.totalorder %s2227_s26, %s1735_s18  ;;  %p1744_p11 = scmp.lt.s32.totalorder %s1735_s18, %s1735_s18 }
  0xde   : > { %p1738_p7 = pnand %p1736_p5, %p2099_p8  ;;  %p1745_p12 = por %p1744_p11, %p1743_p10 }
  0xe0   : > { %p1739_p9 = pneg %p1738_p7 }
  0xe2   : > { %p1746_p4 = pnand %p1745_p12, %p1739_p9 }
  0xe4   : > { %1749 = shalt.err (!%p1746_p4)
}
  0xe5   : > { %1413 = dma.hbm_to_vmem [thread:$0]  (!%p2083_p6), %s2578_s8, 1024, %s2227_s26, [#allocation15], %s1968_s17, %s1968_s17, %s1969_s28  }
  0xe6   : > { %s1972_s16 = smov [#allocation19]   ;;  %s1973_s30 = smov [#allocation20]  }
  0xe7   : > { %s435_s19 = sshll.u32 %s1972_s16, 4  ;;  %s449_s1 = sshll.u32 %s1973_s30, 4  ;;  %s436_s19 = int_to_ptr.vmem [resolvable:$true] %s435_s19  ;;  %s2276_s1 = int_to_ptr.vmem [resolvable:$true] %s449_s1 }
  0xe8   : > { %s1750_s12 = scalar_lea.hbm %s2580_s10, 256 }
  0xe9   : > { %p1751_p13 = scmp.ne.s32.totalorder %s2580_s10, %s1750_s12  ;;  %p1757_p3 = scmp.lt.u32.totalorder %s1750_s12, %s2580_s10 }
  0xeb   : > { %p1753_p0 = pnand %p1751_p13, %p2099_p8 }
  0xed   : > { %p1754_p1 = pneg %p1753_p0 }
  0xef   : > { %p1759_p2 = pnand %p1757_p3, %p1754_p1 }
  0xf1   : > { %1762 = shalt.err (!%p1759_p2)
}
  0xf2   : > { %s1763_s2 = scalar_lea.vmem %s436_s19, 256  ;;  %p1771_p10 = scmp.lt.s32.totalorder %s436_s19, %s436_s19 }
  0xf3   : > { %p1764_p5 = scmp.ne.s32.totalorder %s436_s19, %s1763_s2  ;;  %p1772_p11 = scmp.lt.s32.totalorder %s1763_s2, %s1763_s2 }
  0xf5   : > { %p1766_p7 = pnand %p1764_p5, %p2099_p8  ;;  %p1773_p12 = por %p1772_p11, %p1771_p10 }
  0xf7   : > { %p1767_p9 = pneg %p1766_p7 }
  0xf9   : > { %p1774_p4 = pnand %p1773_p12, %p1767_p9 }
  0xfb   : > { %1777 = shalt.err (!%p1774_p4)
}
  0xfc   : > { %1419 = dma.hbm_to_vmem [thread:$0]  (!%p2083_p6), %s2580_s10, 256, %s436_s19, [#allocation18], %s1968_s17, %s1968_s17, %s1969_s28  }
  0xfd   : > { %s1778_s12 = scalar_lea.hbm %s2581_s11, 16 }
  0xfe   : > { %p1779_p13 = scmp.ne.s32.totalorder %s2581_s11, %s1778_s12  ;;  %p1785_p3 = scmp.lt.u32.totalorder %s1778_s12, %s2581_s11 }
 0x100   : > { %p1781_p0 = pnand %p1779_p13, %p2099_p8 }
 0x102   : > { %p1782_p1 = pneg %p1781_p0 }
 0x104   : > { %p1787_p2 = pnand %p1785_p3, %p1782_p1 }
 0x106   : > { %1790 = shalt.err (!%p1787_p2)
}
 0x107   : > { %s1791_s17 = scalar_lea.vmem %s2276_s1, 16  ;;  %s1798_s28 = scalar_lea.vmem %s2276_s1, 32 }
 0x108   : > { %p1792_p5 = scmp.ne.s32.totalorder %s2276_s1, %s1791_s17  ;;  %p1799_p10 = scmp.lt.s32.totalorder %s2276_s1, %s2276_s1 }
 0x109   : > { %p1800_p11 = scmp.lt.s32.totalorder %s1798_s28, %s1791_s17 }
 0x10a   : > { %p1794_p7 = pnand %p1792_p5, %p2099_p8 }
 0x10b   : > { %p1801_p12 = por %p1800_p11, %p1799_p10 }
 0x10c   : > { %p1795_p9 = pneg %p1794_p7 }
 0x10e   : > { %p1802_p4 = pnand %p1801_p12, %p1795_p9 }
 0x110   : > { %1805 = shalt.err (!%p1802_p4)
}
 0x111   : > { %1422 = dma.hbm_to_vmem [thread:$0]  (!%p2083_p6), %s2581_s11, 16, %s2276_s1, [#allocation21]  }
 0x112   : > { %s1203_s15 = sadd.s32 4294967294, %s1960_s24   ;;  %s2325_s13 = sadd.s32 1, %s1960_s24  }
 0x113   : > { %s40_s16 = ssub.s32 %s1960_s24, %s2325_s13  ;;  %s43_s30 = sadd.s32 1, %s1956_s23 }
 0x114   : > { %p41_p8 = scmp.eq.s32.totalorder %s40_s16, 0  ;;  %p50_p13 = scmp.ne.s32.totalorder %s1956_s23, %s1952_s22 }
 0x115   : > { %p51_p0 = scmp.eq.s32.totalorder %s1960_s24, 0  ;;  %p56_p1 = scmp.ne.s32.totalorder %s1952_s22, %s1948_s21 }
 0x116   : > { %s2336_s14 = scalar_select %p41_p8, %s1956_s23, %s43_s30  }
 0x117   : > { %p2338_p3 = por %p51_p0, %p50_p13  ;;  %p2608_p2 = scmp.eq.s32.totalorder %s2065_s27, 0 }
 0x118   : > { %p316_p5 = scmp.eq.s32.totalorder %s2065_s27, 1  ;;  %p322_p7 = scmp.eq.s32.totalorder %s1203_s15, 1 }
 0x119   : > { %p2344_p6 = por %p2608_p2, %p56_p1  ;;  %p1444_p9 = scmp.lt.s32.totalorder %s1960_s24, 2 }
 0x11a   : > { %s2351_s12 = sand.u32 1, %s1956_s23   ;;  %p2353_p10 = por %p316_p5, %p50_p13 }
 0x11b   : > { %s2609_s1 = scalar_select %p2344_p6, 1, 0 }
 0x11c   : > { %s2610_s29 = scalar_select %p2353_p10, 1, 0 }
 0x11d   : > { %p2357_p11 = por %p322_p7, %p56_p1  ;;  %s1216_s20 = sshll.u32 %s2351_s12, 3 }
 0x11e   : > { %s1217_s26 = sshll.u32 %s1960_s24, 7  ;;  %s2612_s0 = sld [smem:[#allocation33_spill]] }
 0x11f   : > { %s2611_s18 = scalar_select %p2357_p11, 1, 0 }
 0x120   : > { %s464_s2 = scalar_lea.vmem [#allocation2], %s1216_s20  ;;  %p2372_p12 = pnand %p1444_p9, %p2338_p3 }
 0x121   : > { %s471_s15 = sshll.u32 %s464_s2, 4  ;;  %s461_s17 = scalar_lea.sflag [#allocation3], %s2351_s12  ;;  %s2368_s15 = int_to_ptr.vmem [resolvable:$true] %s471_s15 }
 0x122   : > { %p1808_p8 = pneg %p2372_p12 }
 0x124   : > { %s2366_s19 = scalar_lea.hbm %s2612_s0, %s1217_s26  ;;  %s1811_s25 = scalar_lea.hbm %s2612_s0, 256 }
 0x125   : > { %s1806_s26 = scalar_lea.hbm %s2366_s19, 128  ;;  %p1812_p1 = scmp.lt.u32.totalorder %s2366_s19, %s2612_s0 }
 0x126   : > { %p1807_p4 = scmp.ne.s32.totalorder %s2366_s19, %s1806_s26  ;;  %p1813_p3 = scmp.lt.u32.totalorder %s1811_s25, %s1806_s26 }
 0x127   : > { %p1815_p5 = scmp.lt.u32.totalorder %s1806_s26, %s2366_s19 }
 0x128   : > { %p1809_p13 = pnand %p1808_p8, %p1807_p4  ;;  %p1814_p2 = por %p1813_p3, %p1812_p1 }
 0x12a   : > { %p1810_p0 = pneg %p1809_p13  ;;  %p1816_p7 = por %p1815_p5, %p1814_p2 }
 0x12c   : > { %p1817_p9 = pnand %p1816_p7, %p1810_p0 }
 0x12e   : > { %1820 = shalt.err (!%p1817_p9)
}
 0x12f   : > { %s1821_s30 = scalar_lea.vmem %s2368_s15, 128  ;;  %s1974_s20 = smov [#allocation2]  }
 0x130   : > { %p1822_p4 = scmp.ne.s32.totalorder %s2368_s15, %s1821_s30  ;;  %s1826_s28 = sshll.u32 %s1974_s20, 4  ;;  %s1827_s28 = int_to_ptr.vmem [resolvable:$false] %s1826_s28 }
 0x131   : > { %s1828_s4 = scalar_lea.vmem %s1827_s28, 256  ;;  %p1829_p10 = scmp.lt.s32.totalorder %s2368_s15, %s1827_s28 }
 0x132   : > { %p1824_p13 = pnand %p1822_p4, %p1808_p8  ;;  %p1830_p1 = scmp.lt.s32.totalorder %s1828_s4, %s1821_s30 }
 0x134   : > { %p1825_p11 = pneg %p1824_p13  ;;  %p1831_p3 = por %p1830_p1, %p1829_p10 }
 0x136   : > { %p1832_p2 = pnand %p1831_p3, %p1825_p11 }
 0x138   : > { %1835 = shalt.err (!%p1832_p2)
}
 0x139   : > { %1426 = dma.hbm_to_vmem [thread:$0]  (!%p2372_p12), %s2366_s19, 128, %s2368_s15, %s461_s17  }
 0x13a   : > { %s1219_s26 = sshll.u32 %s1960_s24, 6  ;;  %s2614_s20 = sld [smem:[#allocation34_spill]] }
 0x13b   : > { %s2615_s28 = sshll.u32 %s2351_s12, 2  ;;  %s2616_s0 = sand.u32 1, %s1960_s24  }
 0x13c   : > { %s482_s30 = scalar_lea.vmem [#allocation5], %s2615_s28  ;;  %s479_s5 = scalar_lea.sflag [#allocation6], %s2616_s0 }
 0x13d   : > { %s489_s4 = sshll.u32 %s482_s30, 4  ;;  %s490_s4 = int_to_ptr.vmem [resolvable:$true] %s489_s4 }
 0x140   : > { %s2408_s3 = scalar_lea.hbm %s2614_s20, %s1219_s26  ;;  %s1841_s17 = scalar_lea.hbm %s2614_s20, 128 }
 0x141   : > { %s1836_s6 = scalar_lea.hbm %s2408_s3, 64  ;;  %p1842_p5 = scmp.lt.u32.totalorder %s2408_s3, %s2614_s20 }
 0x142   : > { %p1837_p10 = scmp.ne.s32.totalorder %s2408_s3, %s1836_s6  ;;  %p1843_p7 = scmp.lt.u32.totalorder %s1841_s17, %s1836_s6 }
 0x143   : > { %p1845_p4 = scmp.lt.u32.totalorder %s1836_s6, %s2408_s3 }
 0x144   : > { %p1839_p11 = pnand %p1837_p10, %p1808_p8  ;;  %p1844_p9 = por %p1843_p7, %p1842_p5 }
 0x146   : > { %p1840_p0 = pneg %p1839_p11  ;;  %p1846_p13 = por %p1845_p4, %p1844_p9 }
 0x148   : > { %p1847_p1 = pnand %p1846_p13, %p1840_p0 }
 0x14a   : > { %1850 = shalt.err (!%p1847_p1)
}
 0x14b   : > { %s1851_s0 = scalar_lea.vmem %s490_s4, 64  ;;  %s1975_s25 = smov [#allocation5]  }
 0x14c   : > { %p1852_p3 = scmp.ne.s32.totalorder %s490_s4, %s1851_s0  ;;  %s1856_s2 = sshll.u32 %s1975_s25, 4  ;;  %s1857_s2 = int_to_ptr.vmem [resolvable:$false] %s1856_s2 }
 0x14d   : > { %s1858_s28 = scalar_lea.vmem %s1857_s2, 128  ;;  %p1859_p11 = scmp.lt.s32.totalorder %s490_s4, %s1857_s2 }
 0x14e   : > { %p1854_p2 = pnand %p1852_p3, %p1808_p8  ;;  %p1860_p6 = scmp.lt.s32.totalorder %s1858_s28, %s1851_s0 }
 0x150   : > { %p1855_p10 = pneg %p1854_p2  ;;  %p1861_p5 = por %p1860_p6, %p1859_p11 }
 0x152   : > { %p1862_p7 = pnand %p1861_p5, %p1855_p10 }
 0x154   : > { %1865 = shalt.err (!%p1862_p7)
}
 0x155   : > { %1429 = dma.hbm_to_vmem [thread:$0]  (!%p2372_p12), %s2408_s3, 64, %s490_s4, %s479_s5  }
 0x156   : > { %s2617_s6 = sld [smem:[#allocation32_spill]] }
 0x15c   : > { %p2618_p0 = scmp.ne.s32.totalorder %s2617_s6, 0 }
 0x15d   : > { %s2436_s30 = sand.u32 (!%p2618_p0), 1, %s1952_s22   ;;  %p2619_p6 = scmp.ne.s32.totalorder (!%p2618_p0), %s2609_s1, 0 }
 0x15e   : > { %498 = sbr.rel (%p2618_p0) target bundleno = 1114 (0x45a), region = 68  ;;  %s1221_s19 = sshll.u32 (!%p2618_p0), %s2436_s30, 3 }
 0x15f   : > { %s501_s15 = scalar_lea.sflag (!%p2618_p0), [#allocation3], %s2436_s30  ;;  %s2442_s17 = scalar_lea.vmem (!%p2618_p0), [#allocation2], %s1221_s19 }
 0x165   : > { %1911 = dma.done.wait (%p2619_p6), %s501_s15, 128  }
 0x166   : > { %1913 = vsyncadd (%p2619_p6), %s501_s15, 4294967168  ;;  %s509_s3 = sand.u32 1, %s2065_s27   ;;  %s1222_s5 = sshll.u32 %s2436_s30, 2 }
 0x167   : > { %s510_s16 = scalar_lea.sflag [#allocation6], %s509_s3  ;;  %s2450_s4 = scalar_lea.vmem [#allocation5], %s1222_s5 }
 0x168   : > { %1915 = dma.done.wait (%p2619_p6), %s510_s16, 64  }
 0x169   : > { %1917 = vsyncadd (%p2619_p6), %s510_s16, 4294967232  ;;  %p2620_p12 = scmp.eq.s32.totalorder %s2065_s27, 0 }
 0x16b   : > { %1919 = dma.done.wait (%p2620_p12), [#allocation6], 16   ;;  %p2621_p8 = pmov %p2620_p12 }
 0x16d   : > { %1921 = vsyncadd (%p2621_p8), [#allocation6], 4294967280  ;;  %p2622_p9 = pmov %p2621_p8 }
 0x16e   : > { %p2623_p4 = pmov %p2621_p8 }
 0x16f   : > { %1923 = dma.done.wait (%p2622_p9), [#allocation9], 1040  }
 0x170   : > { %1925 = vsyncadd (%p2623_p4), [#allocation9], 4294966256  ;;  %p2624_p13 = pmov %p2623_p4 }
 0x171   : > { %p2625_p1 = pmov %p2623_p4 }
 0x172   : > { %1927 = dma.done.wait (%p2624_p13), [#allocation12], 272  }
 0x173   : > { %1929 = vsyncadd (%p2625_p1), [#allocation12], 4294967024  ;;  %p2626_p3 = pmov %p2625_p1 }
 0x174   : > { %p2627_p2 = pmov %p2625_p1 }
 0x175   : > { %1931 = dma.done.wait (%p2626_p3), [#allocation15], 1040  }
 0x176   : > { %1933 = vsyncadd (%p2627_p2), [#allocation15], 4294966256  ;;  %p2628_p10 = pmov %p2625_p1 }
 0x177   : > { %p2629_p11 = pmov %p2625_p1 }
 0x178   : > { %1935 = dma.done.wait (%p2628_p10), [#allocation18], 272  }
 0x179   : > { %1937 = vsyncadd (%p2629_p11), [#allocation18], 4294967024  ;;  %p2630_p5 = pmov %p2625_p1 }
 0x17a   : > { %p2631_p7 = pmov %p2625_p1 }
 0x17b   : > { %1939 = dma.done.wait (%p2630_p5), [#allocation21], 16  }
 0x17c   : > { %1941 = vsyncadd (%p2631_p7), [#allocation21], 4294967280  ;;  %v1976_v0 = vmov 0.0   ;;  %vm1977_vm0 = vmmov 0   ;;  %v1502_v1 = vld [vmem:[#allocation10] sm:$0xff]   ;;  %v1503_v2 = vld [vmem:[#allocation10 + $0x8] sm:$0xff]  }
 0x17d   : > { %1290 = vmatprep.subr.bf16.mxu0 %v1976_v0  ;;  %1306 = vmatprep.mubr.msk.bf16.mxu0 %vm1977_vm0, %v1976_v0  ;;  %v1504_v3 = vld [vmem:[#allocation10 + $0x10] sm:$0xff]   ;;  %vm738_vm1 = vcmask 261120   ;;  %v1505_v5 = vld [vmem:[#allocation10 + $0x18] sm:$0xff]   ;;  %v1510_v7 = vld [vmem:[#allocation13] sm:$0xff]   ;;  %s1263_s1 = sshll.u32 %s2065_s27, 7  ;;  %s598_s12 = scalar_lea.vmem [#allocation22], %s1221_s19 }
 0x17e   : > { %1310 = vmatprep.subr.bf16.mxu1 %v1976_v0  ;;  %1314 = vmatprep.mubr.msk.bf16.mxu1 %vm1977_vm0, %v1976_v0  ;;  %v600_v4 = vld [vmem:[%s2442_s17] sm:$0xff]  ;;  %v1509_v11 = vld [vmem:[#allocation10 + $0x38] sm:$0xff]   ;;  %v1234_v19 = vld [vmem:[#allocation11] ss:$0 sm:$0xff]  ;;  %s1015_s26 = sshll.u32 %s598_s12, 4  ;;  %s2632_s2 = sld [smem:[#allocation40_spill]]  ;;  %s2527_s26 = int_to_ptr.vmem [resolvable:$true] %s1015_s26 }
 0x17f   : > { %1291 = vmatpush3.bf16.msra.mxu0 %v1502_v1  ;;  %v977_v6 = vsel %vm738_vm1, %v600_v4, 0.0  ;;  %1311 = vmatpush3.bf16.msra.mxu1 %v1510_v7  ;;  %v1506_v8 = vld [vmem:[#allocation10 + $0x20] sm:$0xff]   ;;  %v1507_v9 = vld [vmem:[#allocation10 + $0x28] sm:$0xff]   ;;  %v1508_v10 = vld [vmem:[#allocation10 + $0x30] sm:$0xff]   ;;  %s1002_s27 = scalar_lea.sflag [#allocation4], %s2436_s30  ;;  %s1866_s6 = scalar_lea.vmem %s2527_s26, 128 }
 0x180   : > { %1292 = vmatprep.subr.bf16.mxu0 %v1976_v0  ;;  %978 = vadd.xlane.f32.xlu0 %v977_v6  ;;  %v601_v12 = vld [vmem:[%s2450_s4] sm:$0xf]  ;;  %v1511_v13 = vld [vmem:[#allocation13 + $0x8] sm:$0xff]   ;;  %v1513_v28 = vld [vmem:[#allocation16 + $0x8] sm:$0xff]   ;;  %p1867_p0 = scmp.ne.s32.totalorder %s2527_s26, %s1866_s6  ;;  %p2633_p6 = scmp.ne.s32.totalorder %s2610_s29, 0 }
 0x181   : > { %1312 = vmatprep.subr.bf16.mxu1 %v1976_v0  ;;  %v1512_v26 = vld [vmem:[#allocation16] sm:$0xff]   ;;  %v1514_v29 = vld [vmem:[#allocation16 + $0x10] sm:$0xff]   ;;  %v1515_v30 = vld [vmem:[#allocation16 + $0x18] sm:$0xff]   ;;  %s1978_s19 = smov [#allocation22]  }
 0x182   : > { %v1516_v31 = vld [vmem:[#allocation16 + $0x20] sm:$0xff]   ;;  %v1517_v32 = vld [vmem:[#allocation16 + $0x28] sm:$0xff]   ;;  %v1518_v33 = vld [vmem:[#allocation16 + $0x30] sm:$0xff]   ;;  %p1868_p12 = pnand %p1867_p0, %p2633_p6  ;;  %s1870_s15 = sshll.u32 %s1978_s19, 4  ;;  %s1871_s15 = int_to_ptr.vmem [resolvable:$false] %s1870_s15 }
 0x183   : > { %1293 = vmatpush3.bf16.msra.mxu0 %v1503_v2  ;;  %1313 = vmatpush3.bf16.msra.mxu1 %v1511_v13  ;;  %v1519_v34 = vld [vmem:[#allocation16 + $0x38] sm:$0xff]   ;;  %v1520_v35 = vld [vmem:[#allocation19] sm:$0xff]   ;;  %v1521_v36 = vld [vmem:[#allocation19 + $0x8] sm:$0xff]   ;;  %s1872_s17 = scalar_lea.vmem %s1871_s15, 256  ;;  %p1873_p9 = scmp.lt.s32.totalorder %s2527_s26, %s1871_s15 }
 0x184   : > { %1294 = vmatprep.subr.bf16.mxu0 %v1976_v0  ;;  %1318 = vmatprep.subr.bf16.mxu1 %v1976_v0  ;;  %v1247_v41 = vld [vmem:[#allocation17] ss:$0 sm:$0xff]  ;;  %v1243_v57 = vld [vmem:[#allocation14] ss:$0 sm:$0xff]  ;;  %v1260_v59 = vld [vmem:[#allocation7] ss:$0 sm:$0xff]  ;;  %s2525_s28 = scalar_lea.hbm %s2632_s2, %s1263_s1  ;;  %p1869_p8 = pneg %p1868_p12 }
 0x185   : > { %v1256_v61 = vld [vmem:[#allocation20] ss:$0 sm:$0xff]  ;;  %v1261_v1 = vld [vmem:[#allocation8] ss:$0 sm:$0xff]  ;;  %p1874_p4 = scmp.lt.s32.totalorder %s1872_s17, %s1866_s6 }
 0x187   : > { %1295 = vmatpush3.bf16.msra.mxu0 %v1504_v3  ;;  %p1875_p13 = por %p1874_p4, %p1873_p9 }
 0x188   : > { %1296 = vmatprep.subr.bf16.mxu0 %v1976_v0 }
 0x189   : > { %p1876_p1 = pnand %p1875_p13, %p1869_p8 }
 0x18b   : > { %1297 = vmatpush3.bf16.msra.mxu0 %v1505_v5 }
 0x18c   : > { %1298 = vmatprep.subr.bf16.mxu0 %v1976_v0 }
 0x18f   : > { %1299 = vmatpush3.bf16.msra.mxu0 %v1506_v8 }
 0x190   : > { %1300 = vmatprep.subr.bf16.mxu0 %v1976_v0 }
 0x193   : > { %1301 = vmatpush3.bf16.msra.mxu0 %v1507_v9 }
 0x194   : > { %1302 = vmatprep.subr.bf16.mxu0 %v1976_v0 }
 0x197   : > { %1303 = vmatpush3.bf16.msra.mxu0 %v1508_v10 }
 0x198   : > { %1304 = vmatprep.subr.bf16.mxu0 %v1976_v0 }
 0x19b   : > { %1305 = vmatpush3.bf16.msra.mxu0 %v1509_v11 }
 0x19c   : > { %1338 = vmatprep.subr.bf16.mxu0 %v1976_v0 }
 0x19e   : > { %1307 = vmatmul.mubr.bf16.vlgmr.msra.gmra.mrb[0].mxu0 %v601_v12 }
 0x19f   : > { %1342 = vmatprep.mubr.msk.bf16.mxu0 %vm1977_vm0, %v1976_v0  ;;  %1339 = vmatpush3.bf16.msra.mxu0 %v1520_v35 }
 0x1a0   : > { %1340 = vmatprep.subr.bf16.mxu0 %v1976_v0 }
 0x1a3   : > { %1341 = vmatpush3.bf16.msra.mxu0 %v1521_v36 }
 0x20d   : > { %v979_v14 = vpop.xlane.xlu0 %978 }
 0x20e   : > { %v981_v15 = vmul.f32 0.03125, %v979_v14 }
 0x210   : > { %v2501_v16 = vsub.f32 %v600_v4, %v981_v15 }
 0x212   : > { %v983_v17 = vmul.f32 %v2501_v16, %v2501_v16 }
 0x214   : > { %v984_v18 = vsel %vm738_vm1, %v983_v17, 0.0 }
 0x215   : > { %985 = vadd.xlane.f32.xlu0 %v984_v18 }
 0x271   : > { %v707_v20 = vpop.f32.mrb[0].mxu0 }
 0x272   : > { %v708_v21 = vadd.f32 %v1234_v19, %v707_v20  ;;  %v1308_v22 = vpop.f32.mrb[1].mxu0 }
 0x273   : > { %v710_v23 = vpop.f32.mrb[2].mxu0 }
 0x274   : > { %v713_v24 = vmax.f32 %v708_v21, 0.0  ;;  %v1309_v25 = vpop.f32.mrb[3].mxu0 }
 0x276   : > { %v714_v27 = vpack.c.bf16 %v713_v24, %v713_v24 }
 0x278   : > { %1315 = vmatmul.mubr.msk.bf16.vlgmr.msra.gmra.mrb[0].mxu1 %vm738_vm1, %v714_v27 }
 0x279   : > { %1319 = vmatpush3.bf16.msra.mxu1 %v1512_v26  ;;  %1334 = vmatprep.mubr.msk.bf16.mxu1 %vm1977_vm0, %v1976_v0 }
 0x27a   : > { %1320 = vmatprep.subr.bf16.mxu1 %v1976_v0 }
 0x27d   : > { %1321 = vmatpush3.bf16.msra.mxu1 %v1513_v28 }
 0x27e   : > { %1322 = vmatprep.subr.bf16.mxu1 %v1976_v0 }
 0x281   : > { %1323 = vmatpush3.bf16.msra.mxu1 %v1514_v29 }
 0x282   : > { %1324 = vmatprep.subr.bf16.mxu1 %v1976_v0 }
 0x285   : > { %1325 = vmatpush3.bf16.msra.mxu1 %v1515_v30 }
 0x286   : > { %1326 = vmatprep.subr.bf16.mxu1 %v1976_v0 }
 0x289   : > { %1327 = vmatpush3.bf16.msra.mxu1 %v1516_v31 }
 0x28a   : > { %1328 = vmatprep.subr.bf16.mxu1 %v1976_v0 }
 0x28d   : > { %1329 = vmatpush3.bf16.msra.mxu1 %v1517_v32 }
 0x28e   : > { %1330 = vmatprep.subr.bf16.mxu1 %v1976_v0 }
 0x291   : > { %1331 = vmatpush3.bf16.msra.mxu1 %v1518_v33 }
 0x292   : > { %1332 = vmatprep.subr.bf16.mxu1 %v1976_v0 }
 0x295   : > { %1333 = vmatpush3.bf16.msra.mxu1 %v1519_v34 }
 0x298   : > { %1335 = vmatmul.mubr.bf16.vlgmr.msra.gmra.mrb[4].mxu1 %v601_v12 }
 0x2a2   : > { %v986_v49 = vpop.xlane.xlu0 %985 }
 0x2a3   : > { %v987_v50 = vmul.f32 0.032258064, %v986_v49 }
 0x2a5   : > { %1522 = vrsqrt.f32 %v987_v50  ;;  %vm990_vm2 = vcmp.eq.f32.partialorder %v987_v50, inf  ;;  %v993_v53 = vand.u32 2147483648, %v987_v50  ;;  %vm992_vm3 = vcmp.eq.f32.partialorder %v987_v50, 0.0 }
 0x2af   : > { %v1523_v51 = vpop.eup %1522 }
 0x2b0   : > { %v989_v52 = vmul.f32 %v1523_v51, %v987_v50 }
 0x2b2   : > { %v991_v54 = vsel %vm990_vm2, %v987_v50, %v989_v52 }
 0x2b3   : > { %v994_v55 = vsel %vm992_vm3, %v993_v53, %v991_v54 }
 0x2b4   : > { %v995_v56 = vadd.f32 1e-06, %v994_v55 }
 0x2b6   : > { %1524 = vrcp.f32 %v995_v56 }
 0x2c0   : > { %v1525_v63 = vpop.eup %1524 }
 0x34b   : > { %v776_v37 = vpop.f32.mrb[0].mxu1 }
 0x34c   : > { %v1316_v38 = vpop.f32.mrb[1].mxu1  ;;  %v777_v58 = vadd.f32 %v1243_v57, %v776_v37 }
 0x34d   : > { %v779_v39 = vpop.f32.mrb[2].mxu1 }
 0x34e   : > { %v1317_v40 = vpop.f32.mrb[3].mxu1  ;;  %v968_v60 = vadd.f32 %v1260_v59, %v777_v58 }
 0x350   : > { %v997_v62 = vmul.f32 %v2501_v16, %v968_v60 }
 0x352   : > { %v998_v6 = vmul.f32 %v1525_v63, %v997_v62 }
 0x36b   : > { %v887_v42 = vpop.f32.mrb[4].mxu1 }
 0x36c   : > { %v888_v43 = vadd.f32 %v1247_v41, %v887_v42  ;;  %v1336_v44 = vpop.f32.mrb[5].mxu1 }
 0x36d   : > { %v890_v45 = vpop.f32.mrb[6].mxu1 }
 0x36e   : > { %v893_v46 = vmax.f32 %v888_v43, 0.0  ;;  %v1337_v47 = vpop.f32.mrb[7].mxu1 }
 0x370   : > { %v894_v48 = vpack.c.bf16 %v893_v46, %v893_v46 }
 0x372   : > { %1343 = vmatmul.mubr.msk.bf16.vlgmr.msra.gmra.mrb[4].mxu0 %vm738_vm1, %v894_v48 }
 0x445   : > { %v955_v0 = vpop.f32.mrb[4].mxu0 }
 0x446   : > { %v956_v2 = vadd.f32 %v1256_v61, %v955_v0  ;;  %v1344_v3 = vpop.f32.mrb[5].mxu0 }
 0x447   : > { %v958_v4 = vpop.f32.mrb[6].mxu0 }
 0x448   : > { %v976_v5 = vadd.f32 %v1261_v1, %v956_v2  ;;  %v1345_v7 = vpop.f32.mrb[7].mxu0 }
 0x44a   : > { %v999_v8 = vadd.f32 %v998_v6, %v976_v5 }
 0x44c   : > { %1000 = vst.msk [vmem:[%s598_s12] sm:$0xff] %vm738_vm1, %v999_v8 }
 0x44d   : > { %1879 = shalt.err (!%p1876_p1)
}
 0x44e   : > { %s1880_s30 = scalar_lea.hbm %s2525_s28, 128  ;;  %s1884_s16 = scalar_lea.hbm %s2632_s2, 256 }
 0x44f   : > { %p1881_p3 = scmp.ne.s32.totalorder %s2525_s28, %s1880_s30  ;;  %p1885_p11 = scmp.lt.u32.totalorder %s2525_s28, %s2632_s2 }
 0x450   : > { %p1886_p5 = scmp.lt.u32.totalorder %s1884_s16, %s1880_s30  ;;  %p1888_p0 = scmp.lt.u32.totalorder %s1880_s30, %s2525_s28 }
 0x451   : > { %p1882_p2 = pnand %p1881_p3, %p2633_p6 }
 0x452   : > { %p1887_p7 = por %p1886_p5, %p1885_p11 }
 0x453   : > { %p1883_p10 = pneg %p1882_p2 }
 0x454   : > { %p1889_p12 = por %p1888_p0, %p1887_p7 }
 0x456   : > { %p1890_p8 = pnand %p1889_p12, %p1883_p10 }
 0x458   : > { %1893 = shalt.err (!%p1890_p8)
}
 0x459   : > { %1390 = dma.vmem_to_hbm [thread:$0]  (%p2633_p6), %s2527_s26, 128, %s2525_s28, %s1002_s27  }
 0x45a PF: > { %s1027_s12 = sand.u32 1, %s1948_s21   ;;  %p2634_p9 = scmp.ne.s32.totalorder %s2611_s18, 0 }
 0x45b   : > { %p2635_p4 = scmp.ge.s32.totalorder %s1960_s24, 2  ;;  %s1028_s0 = scalar_lea.sflag [#allocation4], %s1027_s12 }
 0x45d   : > { %p1431_p13 = pnand %p2635_p4, %p2634_p9 }
 0x45f   : > { %1943 = dma.done.wait (!%p1431_p13), %s1028_s0, 128  }
 0x460   : > { %1945 = vsyncadd (!%p1431_p13), %s1028_s0, 4294967168  ;;  %p33_p1 = scmp.ge.s32.totalorder %s2325_s13, 4   ;;  %s2636_s21 = smov %s1952_s22 }
 0x461   : > { %s2637_s22 = smov %s1956_s23  ;;  %s2638_s23 = smov %s2336_s14 }
 0x462   : > { %s2639_s24 = smov %s2325_s13  ;;  %35 = sbr.rel (!%p33_p1) target bundleno = 21 (0x15), region = 166 }
 0x469   :  { %1033 = vsyncpa [#allocation3], 1 }
 0x46a   :  { %1035 = vsyncpa [#allocation3 + $0x1], 1 }
 0x46b   :  { %1036 = vsyncpa [#allocation6], 1 }
 0x46c   :  { %1038 = vsyncpa [#allocation6 + $0x1], 1 }
 0x46d   :  { %1039 = vsyncpa [#allocation9], 1 }
 0x46e   :  { %1040 = vsyncpa [#allocation12], 1 }
 0x46f   :  { %1041 = vsyncpa [#allocation15], 1 }
 0x470   :  { %1042 = vsyncpa [#allocation18], 1 }
 0x471   :  { %1043 = vsyncpa [#allocation21], 1 }
 0x472   :  { %1044 = vsyncpa [#allocation4], 1 }
 0x473   :  { %1046 = vsyncpa [#allocation4 + $0x1], 1 }

</bundles_post_ra>
